<compile_context>
chip_gen: v7x
topology: tpu7x:2x2x1
jax: 0.10.0
libtpu: 0.0.40
codegen_flags: <defaults>
</compile_context>

<pallas_src>
import jax
import jax.numpy as jnp
from jax import lax
from jax.experimental import pallas as pl
from jax.experimental.pallas import tpu as pltpu

LANE = 128  # TPU lane width (last-dim tile)


def _round_up(x, m):
    return (x + m - 1) // m * m


# ----------------------------------------------------------------------------
# Kernel
# ----------------------------------------------------------------------------
def critic_kernel(x_ref, a_ref, w1_ref, b1_ref, w2h_ref, w2a_ref, b2_ref,
                  w3_ref, b3_ref, o_ref):
    md = w1_ref.dtype
    x = x_ref[...].astype(md)          # (TB, S)  f32 -> bf16 in-kernel
    a = a_ref[...].astype(md)          # (TB, A)

    # fc1 + ReLU : MXU in bf16, f32 accumulate, f32 elementwise.
    h1 = jnp.dot(x, w1_ref[...], preferred_element_type=jnp.float32)
    h1 = jnp.maximum(h1 + b1_ref[...], 0.0)                   # (TB, H1p) f32

    # fc2 on concat([h1, a], axis=1)  ==  h1 @ W2[:H1] + a @ W2[H1:]
    h2 = (jnp.dot(h1.astype(md), w2h_ref[...],
                  preferred_element_type=jnp.float32)
          + jnp.dot(a, w2a_ref[...], preferred_element_type=jnp.float32)
          + b2_ref[...])
    h2 = jnp.maximum(h2, 0.0)                                  # (TB, H2p) f32

    # fc3 (out width 1) on the MXU, producing a lane-dense (1, TB) row:
    #   (1, H2p) @ (TB, H2p)^T -> (1, TB)   (NT dimension numbers).
    q = lax.dot_general(w3_ref[...], h2.astype(md),
                        dimension_numbers=(((1,), (1,)), ((), ())),
                        preferred_element_type=jnp.float32)
    o_ref[...] = q + b3_ref[0, 0]


# ----------------------------------------------------------------------------
# Parameter init (mirrors the PyTorch module's init_weights) and prep
# ----------------------------------------------------------------------------
def init_critic_params(key, nb_states, nb_actions, hidden1, hidden2,
                       init_w=0.003):
    """Unpadded f32 params, weights stored (in_features, out_features)."""
    ks = jax.random.split(key, 6)

    def fanin_uniform(k, out_f, in_f):
        # PyTorch fanin_init uses size[0] (= out_features) as fanin.
        v = 1.0 / (out_f ** 0.5)
        w = jax.random.uniform(k, (out_f, in_f), jnp.float32, -v, v)
        return w.T                                            # (in, out)

    def bias_uniform(k, out_f, in_f):
        # nn.Linear default bias init: U(-1/sqrt(in), 1/sqrt(in))
        v = 1.0 / (in_f ** 0.5)
        return jax.random.uniform(k, (1, out_f), jnp.float32, -v, v)

    w1 = fanin_uniform(ks[0], hidden1, nb_states)             # (S, H1)
    b1 = bias_uniform(ks[1], hidden1, nb_states)              # (1, H1)
    w2 = fanin_uniform(ks[2], hidden2, hidden1 + nb_actions)  # (H1+A, H2)
    b2 = bias_uniform(ks[3], hidden2, hidden1 + nb_actions)   # (1, H2)
    w3 = jax.random.uniform(ks[4], (1, hidden2), jnp.float32,
                            -init_w, init_w).T                # (H2, 1)
    b3 = bias_uniform(ks[5], 1, hidden2)                      # (1, 1)
    return (w1, b1, w2, b2, w3, b3)


def prepare_critic_params(params, *, matmul_dtype=jnp.bfloat16):
    """Pad output feature dims to 128 lanes, split W2, cast matmul weights.

    Contraction (K) dims of W1 / W2a keep their natural (small) size — the
    kernel inputs x / a are not feature-padded.
    """
    w1, b1, w2, b2, w3, b3 = params
    S, H1 = w1.shape
    H1A, H2 = w2.shape
    A = H1A - H1
    H1p, H2p = _round_up(H1, LANE), _round_up(H2, LANE)

    def pad_cols(m, c):
        return jnp.pad(m, ((0, 0), (0, c - m.shape[1])))

    w1p = pad_cols(w1, H1p).astype(matmul_dtype)               # (S, H1p)
    b1p = pad_cols(b1, H1p)                                    # (1, H1p) f32
    w2h = jnp.pad(w2[:H1], ((0, H1p - H1), (0, H2p - H2))
                  ).astype(matmul_dtype)                       # (H1p, H2p)
    w2a = pad_cols(w2[H1:], H2p).astype(matmul_dtype)          # (A, H2p)
    b2p = pad_cols(b2, H2p)                                    # (1, H2p) f32
    w3p = pad_cols(w3.T, H2p).astype(matmul_dtype)             # (1, H2p)
    b3p = b3.reshape(1, 1).astype(jnp.float32)                 # (1, 1) -> SMEM
    dims = dict(S=S, A=A, H1p=H1p, H2p=H2p, matmul_dtype=matmul_dtype)
    return (w1p, b1p, w2h, w2a, b2p, w3p, b3p), dims


# ----------------------------------------------------------------------------
# Wrapper
# ----------------------------------------------------------------------------
def critic_forward(x, a, prepared, *, batch_tile=1024, core_parallel=False):
    (w1, b1, w2h, w2a, b2, w3, b3), dims = prepared
    B, S = x.shape
    A = a.shape[1]
    H1p, H2p = dims["H1p"], dims["H2p"]

    # Batch tile: a multiple of 128 (output row is written lane-dense).
    TB = _round_up(min(batch_tile, _round_up(B, LANE)), LANE)
    B_pad = _round_up(B, TB)
    grid = B_pad // TB

    # Only the batch dim is padded; features stay natural width and f32
    # (no padded/cast HBM copies of the batch before the kernel).
    if B_pad != B:
        x = jnp.pad(x, ((0, B_pad - B), (0, 0)))
        a = jnp.pad(a, ((0, B_pad - B), (0, 0)))

    wbytes = jnp.dtype(w1.dtype).itemsize
    flops = 2 * B_pad * (S * H1p + (H1p + A) * H2p + H2p)
    bytes_accessed = (
        (x.size + a.size) * 4
        + (w1.size + w2h.size + w2a.size + w3.size) * wbytes
        + (b1.size + b2.size + b3.size) * 4
        + B_pad * 4)

    # v7x: pass core_parallel=True to shard the batch axis across both
    # TensorCores; default stays "parallel" (safe on single-TC v5e/v6e).
    sem = pltpu.CORE_PARALLEL if core_parallel else "parallel"

    out = pl.pallas_call(
        critic_kernel,
        out_shape=jax.ShapeDtypeStruct((1, B_pad), jnp.float32),
        grid=(grid,),
        in_specs=[
            pl.BlockSpec((TB, S), lambda i: (i, 0)),            # x tile (f32)
            pl.BlockSpec((TB, A), lambda i: (i, 0)),            # a tile (f32)
            pl.BlockSpec((S, H1p), lambda i: (0, 0)),           # W1 (resident)
            pl.BlockSpec((1, H1p), lambda i: (0, 0)),           # b1
            pl.BlockSpec((H1p, H2p), lambda i: (0, 0)),         # W2[:H1]
            pl.BlockSpec((A, H2p), lambda i: (0, 0)),           # W2[H1:]
            pl.BlockSpec((1, H2p), lambda i: (0, 0)),           # b2
            pl.BlockSpec((1, H2p), lambda i: (0, 0)),           # W3 row
            pl.BlockSpec(memory_space=pltpu.MemorySpace.SMEM),  # b3 scalar
        ],
        out_specs=pl.BlockSpec((1, TB), lambda i: (0, i)),      # lane-dense q
        compiler_params=pltpu.CompilerParams(
            dimension_semantics=(sem,),
            vmem_limit_bytes=48 * 1024 * 1024),
        cost_estimate=pl.CostEstimate(
            flops=flops, transcendentals=0, bytes_accessed=bytes_accessed),
    )(x, a, w1, b1, w2h, w2a, b2, w3, b3)

    # (1, B_pad) lane-dense row -> real (B, 1) output.
    return out[0, :B].reshape(B, 1)


# ----------------------------------------------------------------------------
# Pure-JAX references (for correctness checking)
# ----------------------------------------------------------------------------
def critic_ref(x, a, params, matmul_dtype=jnp.float32):
    """Faithful PyTorch forward; with matmul_dtype=bf16 it rounds matmul
    operands the same way the kernel does (bf16 operands, f32 accumulation)."""
    w1, b1, w2, b2, w3, b3 = params
    md = matmul_dtype
    h1 = jax.nn.relu(
        jnp.dot(x.astype(md), w1.astype(md),
                preferred_element_type=jnp.float32) + b1)
    cat = jnp.concatenate([h1, a], axis=1)
    h2 = jax.nn.relu(
        jnp.dot(cat.astype(md), w2.astype(md),
                preferred_element_type=jnp.float32) + b2)
    return jnp.dot(h2.astype(md), w3.astype(md),
                   preferred_element_type=jnp.float32) + b3


# ----------------------------------------------------------------------------
# Self-test
# ----------------------------------------------------------------------------
if __name__ == "__main__":
    # Small shapes consistent with the module (Pendulum-like state/action dims,
    # scaled-down hidden widths).
    batch, nb_states, nb_actions = 8, 8, 4
    hidden1, hidden2 = 32, 32

    key = jax.random.PRNGKey(0)
    k_x, k_a, k_p = jax.random.split(key, 3)
    x = jax.random.normal(k_x, (batch, nb_states), jnp.float32)
    a = jax.random.normal(k_a, (batch, nb_actions), jnp.float32)

    raw_params = init_critic_params(k_p, nb_states, nb_actions,
                                    hidden1, hidden2)
    prepared = prepare_critic_params(raw_params)

    out = jax.block_until_ready(critic_forward(x, a, prepared))
    expected_bf16 = critic_ref(x, a, raw_params, matmul_dtype=jnp.bfloat16)
    expected_f32 = critic_ref(x, a, raw_params, matmul_dtype=jnp.float32)

    assert out.shape == (batch, 1), out.shape
    assert jnp.allclose(out, expected_bf16, atol=1e-3, rtol=1e-3), (
        "mismatch vs bf16-operand reference")
    assert jnp.allclose(out, expected_f32, atol=2e-2, rtol=2e-2), (
        "mismatch vs f32 reference")

    # Multi-tile grid path (non-multiple batch, 2 grid steps).
    batch2 = 200
    x2 = jax.random.normal(jax.random.PRNGKey(1), (batch2, nb_states),
                           jnp.float32)
    a2 = jax.random.normal(jax.random.PRNGKey(2), (batch2, nb_actions),
                           jnp.float32)
    out2 = jax.block_until_ready(
        critic_forward(x2, a2, prepared, batch_tile=128))
    exp2 = critic_ref(x2, a2, raw_params, matmul_dtype=jnp.bfloat16)
    assert out2.shape == (batch2, 1), out2.shape
    assert jnp.allclose(out2, exp2, atol=1e-3, rtol=1e-3), (
        "mismatch vs bf16-operand reference (multi-tile)")

    print("KERNEL_OK")
</pallas_src>

<mosaic_0001>
module attributes {stable_mosaic.version = 11 : i64} {
  func.func @critic_kernel(%arg0: i32, %arg1: memref<128x8xf32, #tpu.memory_space<vmem>>, %arg2: memref<128x4xf32, #tpu.memory_space<vmem>>, %arg3: memref<8x128xbf16, #tpu.memory_space<vmem>>, %arg4: memref<1x128xf32, #tpu.memory_space<vmem>>, %arg5: memref<128x128xbf16, #tpu.memory_space<vmem>>, %arg6: memref<4x128xbf16, #tpu.memory_space<vmem>>, %arg7: memref<1x128xf32, #tpu.memory_space<vmem>>, %arg8: memref<1x128xbf16, #tpu.memory_space<vmem>>, %arg9: memref<1x1xf32, #tpu.memory_space<smem>>, %arg10: memref<1x128xf32, #tpu.memory_space<vmem>>) attributes {dimension_semantics = [#tpu.dimension_semantics<parallel>], iteration_bounds = array<i64: 1>, scalar_prefetch = 0 : i64, scratch_operands = 0 : i64, tpu.core_type = #tpu.core_type<tc>, window_params = [{transform_indices = @transform_0, window_bounds = array<i64: 128, 8>}, {transform_indices = @transform_1, window_bounds = array<i64: 128, 4>}, {pipeline_mode = #tpu.pipeline_mode<synchronous>, transform_indices = @transform_2, window_bounds = array<i64: 8, 128>}, {pipeline_mode = #tpu.pipeline_mode<synchronous>, transform_indices = @transform_3, window_bounds = array<i64: 1, 128>}, {pipeline_mode = #tpu.pipeline_mode<synchronous>, transform_indices = @transform_4, window_bounds = array<i64: 128, 128>}, {pipeline_mode = #tpu.pipeline_mode<synchronous>, transform_indices = @transform_5, window_bounds = array<i64: 4, 128>}, {pipeline_mode = #tpu.pipeline_mode<synchronous>, transform_indices = @transform_6, window_bounds = array<i64: 1, 128>}, {pipeline_mode = #tpu.pipeline_mode<synchronous>, transform_indices = @transform_7, window_bounds = array<i64: 1, 128>}, {transform_indices = @transform_8, window_bounds = array<i64: 1, 1>}, {transform_indices = @transform_9, window_bounds = array<i64: 1, 128>}]} {
    %c0 = arith.constant 0 : index
    %c0_0 = arith.constant 0 : index
    %0 = vector.load %arg1[%c0, %c0_0] : memref<128x8xf32, #tpu.memory_space<vmem>>, vector<128x8xf32>
    %1 = arith.truncf %0 : vector<128x8xf32> to vector<128x8xbf16>
    %c0_1 = arith.constant 0 : index
    %c0_2 = arith.constant 0 : index
    %2 = vector.load %arg2[%c0_1, %c0_2] : memref<128x4xf32, #tpu.memory_space<vmem>>, vector<128x4xf32>
    %3 = arith.truncf %2 : vector<128x4xf32> to vector<128x4xbf16>
    %c0_3 = arith.constant 0 : index
    %c0_4 = arith.constant 0 : index
    %4 = vector.load %arg3[%c0_3, %c0_4] : memref<8x128xbf16, #tpu.memory_space<vmem>>, vector<8x128xbf16>
    %cst = arith.constant dense<0.000000e+00> : vector<128x128xf32>
    %5 = tpu.matmul %1, %4, %cst {dimension_numbers = #tpu.dot_dimension_numbers<[1], [0], [0], [1], [0, 0, 1, 1], [], []>} : vector<128x8xbf16>, vector<8x128xbf16>, vector<128x128xf32> -> vector<128x128xf32>
    %c0_5 = arith.constant 0 : index
    %c0_6 = arith.constant 0 : index
    %6 = vector.load %arg4[%c0_5, %c0_6] : memref<1x128xf32, #tpu.memory_space<vmem>>, vector<1x128xf32>
    %7 = vector.broadcast %6 : vector<1x128xf32> to vector<128x128xf32>
    %8 = arith.addf %5, %7 : vector<128x128xf32>
    %cst_7 = arith.constant 0.000000e+00 : f32
    %9 = vector.broadcast %cst_7 : f32 to vector<128x128xf32>
    %10 = arith.maximumf %8, %9 : vector<128x128xf32>
    %11 = arith.truncf %10 : vector<128x128xf32> to vector<128x128xbf16>
    %c0_8 = arith.constant 0 : index
    %c0_9 = arith.constant 0 : index
    %12 = vector.load %arg5[%c0_8, %c0_9] : memref<128x128xbf16, #tpu.memory_space<vmem>>, vector<128x128xbf16>
    %cst_10 = arith.constant dense<0.000000e+00> : vector<128x128xf32>
    %13 = tpu.matmul %11, %12, %cst_10 {dimension_numbers = #tpu.dot_dimension_numbers<[1], [0], [0], [1], [0, 0, 1, 1], [], []>} : vector<128x128xbf16>, vector<128x128xbf16>, vector<128x128xf32> -> vector<128x128xf32>
    %c0_11 = arith.constant 0 : index
    %c0_12 = arith.constant 0 : index
    %14 = vector.load %arg6[%c0_11, %c0_12] : memref<4x128xbf16, #tpu.memory_space<vmem>>, vector<4x128xbf16>
    %cst_13 = arith.constant dense<0.000000e+00> : vector<128x128xf32>
    %15 = tpu.matmul %3, %14, %cst_13 {dimension_numbers = #tpu.dot_dimension_numbers<[1], [0], [0], [1], [0, 0, 1, 1], [], []>} : vector<128x4xbf16>, vector<4x128xbf16>, vector<128x128xf32> -> vector<128x128xf32>
    %16 = arith.addf %13, %15 : vector<128x128xf32>
    %c0_14 = arith.constant 0 : index
    %c0_15 = arith.constant 0 : index
    %17 = vector.load %arg7[%c0_14, %c0_15] : memref<1x128xf32, #tpu.memory_space<vmem>>, vector<1x128xf32>
    %18 = vector.broadcast %17 : vector<1x128xf32> to vector<128x128xf32>
    %19 = arith.addf %16, %18 : vector<128x128xf32>
    %cst_16 = arith.constant 0.000000e+00 : f32
    %20 = vector.broadcast %cst_16 : f32 to vector<128x128xf32>
    %21 = arith.maximumf %19, %20 : vector<128x128xf32>
    %c0_17 = arith.constant 0 : index
    %c0_18 = arith.constant 0 : index
    %22 = vector.load %arg8[%c0_17, %c0_18] : memref<1x128xbf16, #tpu.memory_space<vmem>>, vector<1x128xbf16>
    %23 = arith.truncf %21 : vector<128x128xf32> to vector<128x128xbf16>
    %cst_19 = arith.constant dense<0.000000e+00> : vector<1x128xf32>
    %24 = tpu.matmul %22, %23, %cst_19 {dimension_numbers = #tpu.dot_dimension_numbers<[1], [1], [0], [0], [0, 0, 1, 0], [], []>} : vector<1x128xbf16>, vector<128x128xbf16>, vector<1x128xf32> -> vector<1x128xf32>
    %c0_20 = arith.constant 0 : index
    %c0_21 = arith.constant 0 : index
    %25 = memref.load %arg9[%c0_20, %c0_21] : memref<1x1xf32, #tpu.memory_space<smem>>
    %26 = vector.broadcast %25 : f32 to vector<1x128xf32>
    %27 = arith.addf %24, %26 : vector<1x128xf32>
    %c0_22 = arith.constant 0 : index
    %c0_23 = arith.constant 0 : index
    %28 = vector.load %arg10[%c0_22, %c0_23] : memref<1x128xf32, #tpu.memory_space<vmem>>, vector<1x128xf32>
    tpu.vector_store %arg10[%c0_22, %c0_23], %27 {strides = array<i32>} : memref<1x128xf32, #tpu.memory_space<vmem>>, vector<1x128xf32>,
    return
  }
  func.func @transform_0(%arg0: i32) -> (i32, i32) {
    %c0_i32 = arith.constant 0 : i32
    %c0_i32_0 = arith.constant 0 : i32
    return %arg0, %c0_i32 : i32, i32
  }
  func.func @transform_1(%arg0: i32) -> (i32, i32) {
    %c0_i32 = arith.constant 0 : i32
    %c0_i32_0 = arith.constant 0 : i32
    return %arg0, %c0_i32 : i32, i32
  }
  func.func @transform_2(%arg0: i32) -> (i32, i32) {
    %c0_i32 = arith.constant 0 : i32
    %c0_i32_0 = arith.constant 0 : i32
    %c0_i32_1 = arith.constant 0 : i32
    return %c0_i32, %c0_i32_0 : i32, i32
  }
  func.func @transform_3(%arg0: i32) -> (i32, i32) {
    %c0_i32 = arith.constant 0 : i32
    %c0_i32_0 = arith.constant 0 : i32
    %c0_i32_1 = arith.constant 0 : i32
    return %c0_i32, %c0_i32_0 : i32, i32
  }
  func.func @transform_4(%arg0: i32) -> (i32, i32) {
    %c0_i32 = arith.constant 0 : i32
    %c0_i32_0 = arith.constant 0 : i32
    %c0_i32_1 = arith.constant 0 : i32
    return %c0_i32, %c0_i32_0 : i32, i32
  }
  func.func @transform_5(%arg0: i32) -> (i32, i32) {
    %c0_i32 = arith.constant 0 : i32
    %c0_i32_0 = arith.constant 0 : i32
    %c0_i32_1 = arith.constant 0 : i32
    return %c0_i32, %c0_i32_0 : i32, i32
  }
  func.func @transform_6(%arg0: i32) -> (i32, i32) {
    %c0_i32 = arith.constant 0 : i32
    %c0_i32_0 = arith.constant 0 : i32
    %c0_i32_1 = arith.constant 0 : i32
    return %c0_i32, %c0_i32_0 : i32, i32
  }
  func.func @transform_7(%arg0: i32) -> (i32, i32) {
    %c0_i32 = arith.constant 0 : i32
    %c0_i32_0 = arith.constant 0 : i32
    %c0_i32_1 = arith.constant 0 : i32
    return %c0_i32, %c0_i32_0 : i32, i32
  }
  func.func @transform_8(%arg0: i32) -> (i32, i32) {
    %c0_i32 = arith.constant 0 : i32
    %c0_i32_0 = arith.constant 0 : i32
    %c0_i32_1 = arith.constant 0 : i32
    return %c0_i32, %c0_i32_0 : i32, i32
  }
  func.func @transform_9(%arg0: i32) -> (i32, i32) {
    %c0_i32 = arith.constant 0 : i32
    %c0_i32_0 = arith.constant 0 : i32
    return %c0_i32, %arg0 : i32, i32
  }
}

</mosaic_0001>

<bundles_post_ra>
// kernel: tpu_custom_call.1
= control target key start
LH: loop header
LB: loop body
LE: loop exit
PB: predicated region body
PF: predicated region fallthrough
CT: control target
= control target key end

     0   :  { %vm116_vm0 = vcmask 1043456   ;;  %vm91_vm1 = vcmask 64512   ;;  %vm283_vm2 = vcmask 1041408   ;;  %vm258_vm3 = vcmask 31744   ;;  %s1072_s0 = inlined_call_operand.vmem [shape: f32[128,8], index: 0, kind: input, shape index: {}]   ;;  %s1073_s1 = inlined_call_operand.vmem [shape: f32[128,4], index: 1, kind: input, shape index: {}]   ;;  %s1074_s2 = inlined_call_operand.vmem [shape: bf16[8,128], index: 2, kind: input, shape index: {}]   ;;  %s1075_s3 = inlined_call_operand.vmem [shape: f32[1,128], index: 3, kind: input, shape index: {}]   ;;  %s1076_s4 = inlined_call_operand.vmem [shape: bf16[128,128], index: 4, kind: input, shape index: {}]   ;;  %s1077_s5 = inlined_call_operand.vmem [shape: bf16[4,128], index: 5, kind: input, shape index: {}]   ;;  %s1078_s6 = inlined_call_operand.vmem [shape: f32[1,128], index: 6, kind: input, shape index: {}]   ;;  %s1079_s7 = inlined_call_operand.vmem [shape: bf16[1,128], index: 7, kind: input, shape index: {}]   ;;  %s1080_s8 = inlined_call_operand.<no memory space> [shape: f32[1,1], index: 8, kind: input, shape index: {}]   ;;  %s1081_s9 = inlined_call_operand.hbm [shape: f32[1,128], index: 9, kind: output, shape index: {}]  }
   0x1   :  { %v83_v0 = vld [vmem:[%s1074_s2] sm:$0xf]  ;;  %v36_v2 = vld [vmem:[%s1072_s0 + $0x8] sm:$0xff]  ;;  %v37_v5 = vld [vmem:[%s1072_s0 + $0x10] sm:$0xff] }
   0x2   :  { %v35_v1 = vld [vmem:[%s1072_s0] sm:$0xff]  ;;  %807 = vmatprep.subr.msk.bf16.mxu0 %vm116_vm0, %v83_v0  ;;  %v118_v3 = vsel %vm116_vm0, %v83_v0, 0  ;;  %v38_v6 = vld [vmem:[%s1072_s0 + $0x18] sm:$0xff]  ;;  %v40_v9 = vld [vmem:[%s1072_s0 + $0x28] sm:$0xff] }
   0x3   :  { %v51_v4 = vpack.c.bf16 %v36_v2, %v35_v1  ;;  %v39_v7 = vld [vmem:[%s1072_s0 + $0x20] sm:$0xff]  ;;  %704 = vmatpush3.bf16.msra.mxu0 %v118_v3  ;;  %v52_v8 = vpack.c.bf16 %v38_v6, %v37_v5  ;;  %v41_v11 = vld [vmem:[%s1072_s0 + $0x30] sm:$0xff]  ;;  %v42_v12 = vld [vmem:[%s1072_s0 + $0x38] sm:$0xff] }
   0x4   :  { %v53_v10 = vpack.c.bf16 %v40_v9, %v39_v7  ;;  %v43_v13 = vld [vmem:[%s1072_s0 + $0x40] sm:$0xff]  ;;  %v44_v14 = vld [vmem:[%s1072_s0 + $0x48] sm:$0xff]  ;;  %v61_v21 = vld [vmem:[%s1073_s1 + $0x10] sm:$0xff]  ;;  %v54_v23 = vpack.c.bf16 %v42_v12, %v41_v11 }
   0x5   :  { %705 = vmatprep.mubr.msk.bf16.mxu0 %vm91_vm1, %v51_v4  ;;  %v257_v15 = vld [vmem:[%s1077_s5] sm:$0x3]  ;;  %v60_v18 = vld [vmem:[%s1073_s1 + $0x8] sm:$0xff]  ;;  %v62_v22 = vld [vmem:[%s1073_s1 + $0x18] sm:$0xff]  ;;  %v55_v28 = vpack.c.bf16 %v44_v14, %v43_v13 }
   0x6   :  { %706 = vmatmul.mubr.msk.bf16.vlgmr.msra.gmra.mrb[0].mxu0 %vm91_vm1, %v52_v8  ;;  %808 = vmatprep.subr.msk.bf16.mxu1 %vm283_vm2, %v257_v15  ;;  %v285_v16 = vsel %vm283_vm2, %v257_v15, 0  ;;  %v59_v17 = vld [vmem:[%s1073_s1] sm:$0xff]  ;;  %v76_v24 = vpack.c.bf16 %v62_v22, %v61_v21  ;;  %v813_v25 = vld [vmem:[%s1076_s4 + $0x8] sm:$0xff]   ;;  %v814_v30 = vld [vmem:[%s1076_s4 + $0x10] sm:$0xff]  }
   0x7   :  { %709 = vmatprep.mubr.msk.bf16.mxu0 %vm91_vm1, %v53_v10  ;;  %722 = vmatpush3.bf16.msra.mxu1 %v285_v16  ;;  %v75_v19 = vpack.c.bf16 %v60_v18, %v59_v17  ;;  %v812_v20 = vld [vmem:[%s1076_s4] sm:$0xff]   ;;  %v64_v27 = vld [vmem:[%s1073_s1 + $0x28] sm:$0xff]  ;;  %v65_v31 = vld [vmem:[%s1073_s1 + $0x30] sm:$0xff] }
   0x8   :  { %739 = vmatprep.subr.bf16.mxu1 %v812_v20  ;;  %v63_v26 = vld [vmem:[%s1073_s1 + $0x20] sm:$0xff]  ;;  %v66_v32 = vld [vmem:[%s1073_s1 + $0x38] sm:$0xff]  ;;  %v68_v34 = vld [vmem:[%s1073_s1 + $0x48] sm:$0xff] }
   0x9   :  { %723 = vmatprep.mubr.msk.bf16.mxu1 %vm258_vm3, %v75_v19  ;;  %v77_v29 = vpack.c.bf16 %v64_v27, %v63_v26  ;;  %v67_v33 = vld [vmem:[%s1073_s1 + $0x40] sm:$0xff]  ;;  %v45_v35 = vld [vmem:[%s1072_s0 + $0x50] sm:$0xff]  ;;  %v46_v36 = vld [vmem:[%s1072_s0 + $0x58] sm:$0xff]  ;;  %v78_v39 = vpack.c.bf16 %v66_v32, %v65_v31 }
   0xa   :  { %724 = vmatmul.mubr.msk.bf16.vlgmr.msra.gmra.mrb[0].mxu1 %vm258_vm3, %v76_v24  ;;  %v47_v37 = vld [vmem:[%s1072_s0 + $0x60] sm:$0xff]  ;;  %v48_v38 = vld [vmem:[%s1072_s0 + $0x68] sm:$0xff]  ;;  %v79_v40 = vpack.c.bf16 %v68_v34, %v67_v33  ;;  %v56_v41 = vpack.c.bf16 %v46_v36, %v45_v35  ;;  %v815_v42 = vld [vmem:[%s1076_s4 + $0x18] sm:$0xff]  }
   0xb   :  { %740 = vmatpush3.bf16.msra.mxu1 %v812_v20  ;;  %727 = vmatprep.mubr.msk.bf16.mxu1 %vm258_vm3, %v77_v29 }
   0xc   :  { %741 = vmatprep.subr.bf16.mxu1 %v813_v25 }
   0xe   :  { %710 = vmatmul.mubr.msk.bf16.gmra.mrb[4].mxu0 %vm91_vm1, %v54_v23 }
   0xf   :  { %713 = vmatprep.mubr.msk.bf16.mxu0 %vm91_vm1, %v55_v28  ;;  %742 = vmatpush3.bf16.msra.mxu1 %v813_v25 }
  0x10   :  { %743 = vmatprep.subr.bf16.mxu1 %v814_v30 }
  0x11   :  { %15 = vsyncpa [#allocation4], 0  ;;  %v57_v43 = vpack.c.bf16 %v48_v38, %v47_v37  ;;  %v69_v44 = vld [vmem:[%s1073_s1 + $0x50] sm:$0xff]  ;;  %v70_v45 = vld [vmem:[%s1073_s1 + $0x58] sm:$0xff]  ;;  %vm845_vm4 = vmmov 0   ;;  %s846_s26 = smov [#allocation3]  }
  0x12   :  { %728 = vmatmul.mubr.msk.bf16.gmra.mrb[4].mxu1 %vm258_vm3, %v78_v39  ;;  %v816_v46 = vld [vmem:[%s1076_s4 + $0x20] sm:$0xff]   ;;  %v49_v47 = vld [vmem:[%s1072_s0 + $0x70] sm:$0xff]  ;;  %v50_v48 = vld [vmem:[%s1072_s0 + $0x78] sm:$0xff]  ;;  %v80_v49 = vpack.c.bf16 %v70_v45, %v69_v44  ;;  %s626_s27 = sshll.u32 %s846_s26, 4  ;;  %s627_s27 = int_to_ptr.vmem [resolvable:$true] %s626_s27 }
  0x13   :  { %744 = vmatpush3.bf16.msra.mxu1 %v814_v30  ;;  %731 = vmatprep.mubr.msk.bf16.mxu1 %vm258_vm3, %v79_v40  ;;  %v58_v50 = vpack.c.bf16 %v50_v48, %v49_v47  ;;  %v817_v51 = vld [vmem:[%s1076_s4 + $0x28] sm:$0xff]   ;;  %v71_v52 = vld [vmem:[%s1073_s1 + $0x60] sm:$0xff]  ;;  %v73_v55 = vld [vmem:[%s1073_s1 + $0x70] sm:$0xff]  ;;  %s820_s28 = scalar_lea.vmem %s627_s27, 16  ;;  %s824_s29 = scalar_lea.vmem %s627_s27, 32 }
  0x14   :  { %745 = vmatprep.subr.bf16.mxu1 %v815_v42  ;;  %v72_v53 = vld [vmem:[%s1073_s1 + $0x68] sm:$0xff]  ;;  %v74_v56 = vld [vmem:[%s1073_s1 + $0x78] sm:$0xff]  ;;  %v818_v57 = vld [vmem:[%s1076_s4 + $0x30] sm:$0xff]   ;;  %p821_p0 = scmp.ne.s32.totalorder %s627_s27, %s820_s28  ;;  %p825_p1 = scmp.lt.s32.totalorder %s627_s27, %s627_s27 }
  0x15   :  { %v81_v54 = vpack.c.bf16 %v72_v53, %v71_v52  ;;  %v82_v58 = vpack.c.bf16 %v74_v56, %v73_v55  ;;  %v819_v59 = vld [vmem:[%s1076_s4 + $0x38] sm:$0xff]   ;;  %v634_v60 = vld [vmem:[%s1075_s3] ss:$0 sm:$0xff]  ;;  %v844_v53 = vmov 0.0   ;;  %p826_p2 = scmp.lt.s32.totalorder %s824_s29, %s820_s28 }
  0x16   :  { %714 = vmatmul.mubr.msk.bf16.gmra.mrb[8].mxu0 %vm91_vm1, %v56_v41  ;;  %771 = vmatprep.subr.bf16.mxu0 %v844_v53 }
  0x17   :  { %717 = vmatprep.mubr.msk.bf16.mxu0 %vm91_vm1, %v57_v43  ;;  %746 = vmatpush3.bf16.msra.mxu1 %v815_v42  ;;  %p827_p3 = por %p826_p2, %p825_p1 }
  0x18   :  { %747 = vmatprep.subr.bf16.mxu1 %v816_v46 }
  0x19   :  { %p828_p4 = pnand %p827_p3, %p821_p0 }
  0x1a   :  { %732 = vmatmul.mubr.msk.bf16.gmra.mrb[8].mxu1 %vm258_vm3, %v80_v49 }
  0x1b   :  { %748 = vmatpush3.bf16.msra.mxu1 %v816_v46  ;;  %735 = vmatprep.mubr.msk.bf16.mxu1 %vm258_vm3, %v81_v54  ;;  %v659_v54 = vld [vmem:[%s1078_s6] ss:$0 sm:$0xff] }
  0x1c   :  { %749 = vmatprep.subr.bf16.mxu1 %v817_v51 }
  0x1e   :  { %718 = vmatmul.mubr.msk.bf16.gmra.mrb[12].mxu0 %vm91_vm1, %v58_v50 }
  0x1f   :  { %750 = vmatpush3.bf16.msra.mxu1 %v817_v51  ;;  %787 = vmatprep.mubr.msk.bf16.mxu0 %vm845_vm4, %v844_v53 }
  0x20   :  { %751 = vmatprep.subr.bf16.mxu1 %v818_v57 }
  0x22   :  { %736 = vmatmul.mubr.msk.bf16.gmra.mrb[12].mxu1 %vm258_vm3, %v82_v58 }
  0x23   :  { %752 = vmatpush3.bf16.msra.mxu1 %v818_v57 }
  0x24   :  { %753 = vmatprep.subr.bf16.mxu1 %v819_v59 }
  0x27   :  { %754 = vmatpush3.bf16.msra.mxu1 %v819_v59 }
  0xd9   :  { %v707_v61 = vpop.f32.mrb[0].mxu0 }
  0xda   :  { %v163_v62 = vadd.f32 %v707_v61, %v634_v60  ;;  %v154_v63 = vpop.f32.mrb[1].mxu0 }
  0xdb   :  { %v155_v0 = vadd.f32 %v634_v60, %v154_v63  ;;  %v708_v1 = vpop.f32.mrb[2].mxu0 }
  0xdc   :  { %v166_v2 = vadd.f32 %v708_v1, %v634_v60  ;;  %v157_v3 = vpop.f32.mrb[3].mxu0  ;;  %v219_v5 = vmax.f32 %v163_v62, 0.0 }
  0xdd   :  { %v158_v4 = vadd.f32 %v634_v60, %v157_v3  ;;  %v217_v7 = vmax.f32 %v155_v0, 0.0 }
  0xde   :  { %v220_v6 = vmax.f32 %v166_v2, 0.0 }
  0xdf   :  { %v218_v8 = vmax.f32 %v158_v4, 0.0 }
  0xe0   :  { %v234_v9 = vpack.c.bf16 %v220_v6, %v219_v5 }
  0xe1   :  { %v233_v10 = vpack.c.bf16 %v218_v8, %v217_v7  ;;  %v711_v11 = vpop.f32.mrb[4].mxu0 }
  0xe2   :  { %v179_v12 = vadd.f32 %v711_v11, %v634_v60  ;;  %v170_v13 = vpop.f32.mrb[5].mxu0 }
  0xe3   :  { %v171_v14 = vadd.f32 %v634_v60, %v170_v13  ;;  %v712_v15 = vpop.f32.mrb[6].mxu0  ;;  %755 = vmatprep.mubr.bf16.mxu1 %v233_v10 }
  0xe4   :  { %v223_v16 = vmax.f32 %v179_v12, 0.0  ;;  %v182_v17 = vadd.f32 %v712_v15, %v634_v60  ;;  %v173_v18 = vpop.f32.mrb[7].mxu0  ;;  %756 = vmatmul.mubr.bf16.vlgmr.msra.gmra.mrb[0].mxu1 %v234_v9 }
  0xe5   :  { %v221_v19 = vmax.f32 %v171_v14, 0.0  ;;  %v174_v20 = vadd.f32 %v634_v60, %v173_v18 }
  0xe6   :  { %v224_v21 = vmax.f32 %v182_v17, 0.0 }
  0xe7   :  { %v222_v22 = vmax.f32 %v174_v20, 0.0 }
  0xe8   :  { %v236_v23 = vpack.c.bf16 %v224_v21, %v223_v16 }
  0xe9   :  { %v235_v24 = vpack.c.bf16 %v222_v22, %v221_v19  ;;  %v715_v25 = vpop.f32.mrb[8].mxu0 }
  0xea   :  { %v195_v26 = vadd.f32 %v715_v25, %v634_v60  ;;  %v186_v27 = vpop.f32.mrb[9].mxu0 }
  0xeb   :  { %v187_v28 = vadd.f32 %v634_v60, %v186_v27  ;;  %v716_v29 = vpop.f32.mrb[10].mxu0  ;;  %759 = vmatprep.mubr.bf16.mxu1 %v235_v24 }
  0xec   :  { %v227_v30 = vmax.f32 %v195_v26, 0.0  ;;  %v198_v31 = vadd.f32 %v716_v29, %v634_v60  ;;  %v189_v32 = vpop.f32.mrb[11].mxu0  ;;  %760 = vmatmul.mubr.bf16.gmra.mrb[4].mxu1 %v236_v23 }
  0xed   :  { %v225_v33 = vmax.f32 %v187_v28, 0.0  ;;  %v190_v34 = vadd.f32 %v634_v60, %v189_v32 }
  0xee   :  { %v228_v35 = vmax.f32 %v198_v31, 0.0 }
  0xef   :  { %v226_v36 = vmax.f32 %v190_v34, 0.0 }
  0xf0   :  { %v238_v37 = vpack.c.bf16 %v228_v35, %v227_v30 }
  0xf1   :  { %v237_v38 = vpack.c.bf16 %v226_v36, %v225_v33  ;;  %v719_v39 = vpop.f32.mrb[12].mxu0 }
  0xf2   :  { %v211_v40 = vadd.f32 %v719_v39, %v634_v60  ;;  %v202_v41 = vpop.f32.mrb[13].mxu0 }
  0xf3   :  { %v203_v42 = vadd.f32 %v634_v60, %v202_v41  ;;  %v720_v43 = vpop.f32.mrb[14].mxu0  ;;  %763 = vmatprep.mubr.bf16.mxu1 %v237_v38 }
  0xf4   :  { %v231_v44 = vmax.f32 %v211_v40, 0.0  ;;  %v214_v45 = vadd.f32 %v720_v43, %v634_v60  ;;  %v205_v46 = vpop.f32.mrb[15].mxu0  ;;  %764 = vmatmul.mubr.bf16.gmra.mrb[8].mxu1 %v238_v37 }
  0xf5   :  { %v229_v47 = vmax.f32 %v203_v42, 0.0  ;;  %v206_v48 = vadd.f32 %v634_v60, %v205_v46 }
  0xf6   :  { %v232_v49 = vmax.f32 %v214_v45, 0.0 }
  0xf7   :  { %v230_v50 = vmax.f32 %v206_v48, 0.0  ;;  %v578_v48 = vstv %s1080_s8 }
  0xf8   :  { %v240_v51 = vpack.c.bf16 %v232_v49, %v231_v44 }
  0xf9   :  { %v239_v52 = vpack.c.bf16 %v230_v50, %v229_v47  ;;  %v568_v47 = vld [vmem:[%s1079_s7] sm:$0x1] }
  0xfb   :  { %767 = vmatprep.mubr.bf16.mxu1 %v239_v52 }
  0xfc   :  { %768 = vmatmul.mubr.bf16.gmra.mrb[12].mxu1 %v240_v51 }
 0x1b7   :  { %v757_v55 = vpop.f32.mrb[0].mxu1 }
 0x1b8   :  { %v538_v56 = vadd.f32 %v757_v55, %v659_v54  ;;  %v466_v57 = vpop.f32.mrb[1].mxu1 }
 0x1b9   :  { %v536_v58 = vadd.f32 %v659_v54, %v466_v57  ;;  %v758_v59 = vpop.f32.mrb[2].mxu1 }
 0x1ba   :  { %v539_v60 = vadd.f32 %v758_v59, %v659_v54  ;;  %v469_v61 = vpop.f32.mrb[3].mxu1  ;;  %v554_v63 = vmax.f32 %v538_v56, 0.0 }
 0x1bb   :  { %v537_v62 = vadd.f32 %v659_v54, %v469_v61  ;;  %v552_v1 = vmax.f32 %v536_v58, 0.0 }
 0x1bc   :  { %v555_v0 = vmax.f32 %v539_v60, 0.0 }
 0x1bd   :  { %v553_v2 = vmax.f32 %v537_v62, 0.0 }
 0x1be   :  { %v570_v3 = vpack.c.bf16 %v555_v0, %v554_v63 }
 0x1bf   :  { %v569_v4 = vpack.c.bf16 %v553_v2, %v552_v1  ;;  %v761_v5 = vpop.f32.mrb[4].mxu1 }
 0x1c0   :  { %v542_v6 = vadd.f32 %v761_v5, %v659_v54  ;;  %v482_v7 = vpop.f32.mrb[5].mxu1 }
 0x1c1   :  { %v540_v8 = vadd.f32 %v659_v54, %v482_v7  ;;  %v762_v9 = vpop.f32.mrb[6].mxu1  ;;  %772 = vmatpush3.bf16.xpose.msra.mxu0 %v569_v4 }
 0x1c2   :  { %v543_v10 = vadd.f32 %v762_v9, %v659_v54  ;;  %v485_v11 = vpop.f32.mrb[7].mxu1  ;;  %773 = vmatprep.subr.bf16.mxu0 %v844_v53  ;;  %v558_v13 = vmax.f32 %v542_v6, 0.0 }
 0x1c3   :  { %v541_v12 = vadd.f32 %v659_v54, %v485_v11  ;;  %v556_v15 = vmax.f32 %v540_v8, 0.0 }
 0x1c4   :  { %v559_v14 = vmax.f32 %v543_v10, 0.0 }
 0x1c5   :  { %v557_v16 = vmax.f32 %v541_v12, 0.0 }
 0x1c6   :  { %v572_v17 = vpack.c.bf16 %v559_v14, %v558_v13 }
 0x1c7   :  { %v571_v18 = vpack.c.bf16 %v557_v16, %v556_v15  ;;  %v765_v19 = vpop.f32.mrb[8].mxu1 }
 0x1c8   :  { %v546_v20 = vadd.f32 %v765_v19, %v659_v54  ;;  %v498_v21 = vpop.f32.mrb[9].mxu1 }
 0x1c9   :  { %v544_v22 = vadd.f32 %v659_v54, %v498_v21  ;;  %v766_v23 = vpop.f32.mrb[10].mxu1  ;;  %774 = vmatpush3.bf16.xpose.msra.mxu0 %v570_v3 }
 0x1ca   :  { %v547_v24 = vadd.f32 %v766_v23, %v659_v54  ;;  %v501_v25 = vpop.f32.mrb[11].mxu1  ;;  %775 = vmatprep.subr.bf16.mxu0 %v844_v53  ;;  %v562_v27 = vmax.f32 %v546_v20, 0.0 }
 0x1cb   :  { %v545_v26 = vadd.f32 %v659_v54, %v501_v25  ;;  %v560_v29 = vmax.f32 %v544_v22, 0.0 }
 0x1cc   :  { %v563_v28 = vmax.f32 %v547_v24, 0.0 }
 0x1cd   :  { %v561_v30 = vmax.f32 %v545_v26, 0.0 }
 0x1ce   :  { %v574_v31 = vpack.c.bf16 %v563_v28, %v562_v27 }
 0x1cf   :  { %v573_v32 = vpack.c.bf16 %v561_v30, %v560_v29  ;;  %v769_v33 = vpop.f32.mrb[12].mxu1 }
 0x1d0   :  { %v550_v34 = vadd.f32 %v769_v33, %v659_v54  ;;  %v514_v35 = vpop.f32.mrb[13].mxu1 }
 0x1d1   :  { %v548_v36 = vadd.f32 %v659_v54, %v514_v35  ;;  %v770_v37 = vpop.f32.mrb[14].mxu1  ;;  %776 = vmatpush3.bf16.xpose.msra.mxu0 %v571_v18 }
 0x1d2   :  { %v551_v38 = vadd.f32 %v770_v37, %v659_v54  ;;  %v517_v39 = vpop.f32.mrb[15].mxu1  ;;  %777 = vmatprep.subr.bf16.mxu0 %v844_v53  ;;  %v566_v41 = vmax.f32 %v550_v34, 0.0 }
 0x1d3   :  { %v549_v40 = vadd.f32 %v659_v54, %v517_v39  ;;  %v564_v43 = vmax.f32 %v548_v36, 0.0 }
 0x1d4   :  { %v567_v42 = vmax.f32 %v551_v38, 0.0 }
 0x1d5   :  { %v565_v44 = vmax.f32 %v549_v40, 0.0 }
 0x1d6   :  { %v576_v45 = vpack.c.bf16 %v567_v42, %v566_v41 }
 0x1d7   :  { %v575_v46 = vpack.c.bf16 %v565_v44, %v564_v43 }
 0x1d9   :  { %778 = vmatpush3.bf16.xpose.msra.mxu0 %v572_v17 }
 0x1da   :  { %779 = vmatprep.subr.bf16.mxu0 %v844_v53 }
 0x1e1   :  { %780 = vmatpush3.bf16.xpose.msra.mxu0 %v573_v32 }
 0x1e2   :  { %781 = vmatprep.subr.bf16.mxu0 %v844_v53 }
 0x1e9   :  { %782 = vmatpush3.bf16.xpose.msra.mxu0 %v574_v31 }
 0x1ea   :  { %783 = vmatprep.subr.bf16.mxu0 %v844_v53 }
 0x1f1   :  { %784 = vmatpush3.bf16.xpose.msra.mxu0 %v575_v46 }
 0x1f2   :  { %785 = vmatprep.subr.bf16.mxu0 %v844_v53 }
 0x1f9   :  { %786 = vmatpush3.bf16.xpose.msra.mxu0 %v576_v45 }
 0x200   :  { %788 = vmatmul.mubr.bf16.vlgmr.msra.gmra.mrb[16].mxu0 %v568_v47 }
 0x2d3   :  { %v613_v49 = vpop.f32.mrb[16].mxu0 }
 0x2d4   :  { %v614_v50 = vadd.f32 %v613_v49, %v578_v48  ;;  %v789_v51 = vpop.f32.mrb[17].mxu0 }
 0x2d5   :  { %v616_v52 = vpop.f32.mrb[18].mxu0 }
 0x2d6   :  { %619 = vst [vmem:[#allocation3] sm:$0x1] %v614_v50  ;;  %v790_v54 = vpop.f32.mrb[19].mxu0 }
 0x2d7   :  { %831 = shalt.err (!%p828_p4)
}
 0x2d8   :  { %s832_s8 = scalar_lea.hbm %s1081_s9, 16 }
 0x2d9   :  { %p833_p5 = scmp.ne.s32.totalorder %s1081_s9, %s832_s8  ;;  %p836_p6 = scmp.lt.u32.totalorder %s832_s8, %s1081_s9 }
 0x2db   :  { %p838_p7 = pnand %p836_p6, %p833_p5 }
 0x2dd   :  { %841 = shalt.err (!%p838_p7)
}
 0x2de   :  { %629 = dma.vmem_to_hbm [thread:$0]  %s627_s27, 16, %s1081_s9, [#allocation4]  }
 0x2df   :  { %842 = dma.done.wait [#allocation4], 16  }
 0x2e0   :  { %843 = vsyncadd [#allocation4], 4294967280 }
 0x2e1   :  { %633 = vsyncpa [#allocation4], 1 }

</bundles_post_ra>
